<compile_context>
chip_gen: v6e
topology: v6e:2x2x1
jax: 0.10.0
libtpu: 0.0.40
codegen_flags: <defaults>
</compile_context>

<pallas_src>
import functools

import jax
import jax.numpy as jnp
from jax.experimental import pallas as pl
from jax.experimental.pallas import tpu as pltpu


def _round_up(n, m):
    return ((n + m - 1) // m) * m


def lstm_heads_kernel(ids_ref, emb_wih_ref, w_hh_ref, b_ref, w_fc_ref, b_fc_ref,
                      out_ref, *, T, Bp, H, Vp):
    """Fused embedding lookup + input projection, full LSTM recurrence, fused FC heads."""
    # Fused embedding gather + hoisted input projection + fused bias, one MXU matmul:
    #   pre = onehot(ids) @ (embedding @ W_ih^T) + (b_ih + b_hh)
    ids = ids_ref[...]                                               # (T*Bp, 1) int32
    vocab_iota = jax.lax.broadcasted_iota(jnp.int32, (T * Bp, Vp), 1)
    onehot = (ids == vocab_iota).astype(jnp.float32)                 # (T*Bp, Vp)
    pre = jnp.dot(onehot, emb_wih_ref[...],
                  preferred_element_type=jnp.float32) + b_ref[...]   # (T*Bp, 4H)

    # Loop-invariant recurrent weight loaded once (value/vreg resident: 32x128 = 4 vregs).
    w_hh = w_hh_ref[...]                                             # (H, 4H)

    h = jnp.zeros((Bp, H), jnp.float32)
    c = jnp.zeros((Bp, H), jnp.float32)

    # Fully unrolled recurrence.  Bp == 8, so each pre slice is one 8-aligned sublane
    # tile group (no sublane shifts on the serial chain).
    for t in range(T):
        z = pre[t * Bp:(t + 1) * Bp, :] + jnp.dot(
            h, w_hh, preferred_element_type=jnp.float32)             # (Bp, 4H)
        sig = jax.nn.sigmoid(z)        # one EUP pass covering i, f, o gate blocks
        tnh = jnp.tanh(z)              # one EUP pass covering the g gate block
        i = sig[:, 0:H]
        f = sig[:, H:2 * H]
        g = tnh[:, 2 * H:3 * H]
        o = sig[:, 3 * H:4 * H]
        c = f * c + i * g
        h = o * jnp.tanh(c)

    # Fused FC heads: single matmul, single lane-dense unmasked (8, 128) store.
    out_ref[...] = (jnp.dot(h, w_fc_ref[...],
                            preferred_element_type=jnp.float32) + b_fc_ref[...])


def pack_params(params):
    """One-time parameter packing -- hoisted out of the per-call forward path."""
    emb = params["embedding"].astype(jnp.float32)     # (V, E)
    V = emb.shape[0]
    H = params["w_hh"].shape[1]                       # weight_hh is (4H, H)
    Vp = _round_up(V, 8)

    # Fold the input projection into the embedding table: onehot @ (emb @ W_ih^T)
    # == embeds @ W_ih^T.  Zero-padded rows (V..Vp-1) are never selected.
    emb_wih = emb @ params["w_ih"].T                  # (V, 4H)
    emb_wih_p = jnp.zeros((Vp, 4 * H), jnp.float32).at[:V, :].set(emb_wih)

    w_hh_t = params["w_hh"].T                         # (H, 4H)
    b = (params["b_ih"] + params["b_hh"]).reshape(1, 4 * H)

    # Fuse + pad the two FC heads: columns [0:O1]=fc1, [O1:O1+O2]=fc2, rest zero.
    O1 = params["w_fc1"].shape[0]
    O2 = params["w_fc2"].shape[0]
    Op = _round_up(O1 + O2, 128)
    w_fc = jnp.concatenate([params["w_fc1"], params["w_fc2"]], axis=0)      # (O1+O2, H)
    w_fc_p = jnp.zeros((Op, H), jnp.float32).at[:O1 + O2, :].set(w_fc).T    # (H, Op)
    b_fc = jnp.concatenate([params["b_fc1"], params["b_fc2"]])
    b_fc_p = jnp.zeros((1, Op), jnp.float32).at[0, :O1 + O2].set(b_fc)

    return {"emb_wih": emb_wih_p, "w_hh_t": w_hh_t, "b": b,
            "w_fc": w_fc_p, "b_fc": b_fc_p}


def semantic_net_forward(x, packed, output_size1, output_size2):
    """x: (B, T) int32 token ids.  Returns (out1, out2) like the PyTorch module."""
    B, T = x.shape
    H = packed["w_hh_t"].shape[0]
    Vp = packed["emb_wih"].shape[0]
    Op = packed["w_fc"].shape[1]
    Bp = _round_up(max(B, 1), 8)      # one sublane tile

    # Tiny per-call id prep (the only wrapper-side work): pad batch to 8, go time-major.
    ids_p = jnp.zeros((Bp, T), jnp.int32).at[:B, :].set(x.astype(jnp.int32))
    ids_tm = jnp.transpose(ids_p, (1, 0)).reshape(T * Bp, 1)

    vmem = pl.BlockSpec(memory_space=pltpu.MemorySpace.VMEM)
    kernel = functools.partial(lstm_heads_kernel, T=T, Bp=Bp, H=H, Vp=Vp)
    out = pl.pallas_call(
        kernel,
        out_shape=jax.ShapeDtypeStruct((Bp, Op), jnp.float32),
        in_specs=[vmem] * 6,
        out_specs=vmem,
    )(ids_tm, packed["emb_wih"], packed["w_hh_t"], packed["b"],
      packed["w_fc"], packed["b_fc"])

    # Un-pad batch / split the fused head slab.
    return out[:B, :output_size1], out[:B, output_size1:output_size1 + output_size2]


def _reference_forward(x, params):
    """Pure-JAX reference mirroring torch.nn.LSTM semantics (gate order i,f,g,o)."""
    emb = params["embedding"]
    embeds = jnp.take(emb, x, axis=0)                 # (B, T, E)
    B, T, _ = embeds.shape
    H = params["w_hh"].shape[1]
    h = jnp.zeros((B, H), jnp.float32)
    c = jnp.zeros((B, H), jnp.float32)
    for t in range(T):
        x_t = embeds[:, t, :]
        z = (x_t @ params["w_ih"].T + params["b_ih"]
             + h @ params["w_hh"].T + params["b_hh"])
        i = jax.nn.sigmoid(z[:, 0:H])
        f = jax.nn.sigmoid(z[:, H:2 * H])
        g = jnp.tanh(z[:, 2 * H:3 * H])
        o = jax.nn.sigmoid(z[:, 3 * H:4 * H])
        c = f * c + i * g
        h = o * jnp.tanh(c)
    out1 = h @ params["w_fc1"].T + params["b_fc1"]
    out2 = h @ params["w_fc2"].T + params["b_fc2"]
    return out1, out2


def init_params(key, vocab, E, H, O1, O2):
    ks = jax.random.split(key, 9)
    s = 0.1
    return {
        "embedding": jax.random.normal(ks[0], (vocab, E), jnp.float32) * s,
        "w_ih":  jax.random.normal(ks[1], (4 * H, E), jnp.float32) * s,
        "w_hh":  jax.random.normal(ks[2], (4 * H, H), jnp.float32) * s,
        "b_ih":  jax.random.normal(ks[3], (4 * H,), jnp.float32) * s,
        "b_hh":  jax.random.normal(ks[4], (4 * H,), jnp.float32) * s,
        "w_fc1": jax.random.normal(ks[5], (O1, H), jnp.float32) * s,
        "b_fc1": jax.random.normal(ks[6], (O1,), jnp.float32) * s,
        "w_fc2": jax.random.normal(ks[7], (O2, H), jnp.float32) * s,
        "b_fc2": jax.random.normal(ks[8], (O2,), jnp.float32) * s,
    }


if __name__ == "__main__":
    B, T = 2, 8            # batch, sequence length
    VOCAB, E = 20, 16      # embedding_matrix.shape[0], embedding_dim
    H = 32                 # hidden_dim
    O1, O2 = 4, 6          # output_size1, output_size2
    # n_layers = 1 (h0.squeeze(0) in the reference implies a single LSTM layer)

    key = jax.random.PRNGKey(0)
    pkey, xkey = jax.random.split(key)
    params = init_params(pkey, VOCAB, E, H, O1, O2)
    packed = pack_params(params)          # one-time packing, not on the forward path
    x = jax.random.randint(xkey, (B, T), 0, VOCAB, dtype=jnp.int32)

    out1, out2 = semantic_net_forward(x, packed, O1, O2)
    jax.block_until_ready((out1, out2))

    ref1, ref2 = _reference_forward(x, params)
    assert out1.shape == (B, O1) and out2.shape == (B, O2)
    assert jnp.allclose(out1, ref1, atol=1e-4, rtol=1e-4)
    assert jnp.allclose(out2, ref2, atol=1e-4, rtol=1e-4)

    print("KERNEL_OK")
</pallas_src>

<mosaic_0001>
module attributes {stable_mosaic.version = 11 : i64} {
  func.func @lstm_heads_kernel(%arg0: memref<64x1xi32, #tpu.memory_space<vmem>>, %arg1: memref<24x128xf32, #tpu.memory_space<vmem>>, %arg2: memref<32x128xf32, #tpu.memory_space<vmem>>, %arg3: memref<1x128xf32, #tpu.memory_space<vmem>>, %arg4: memref<32x128xf32, #tpu.memory_space<vmem>>, %arg5: memref<1x128xf32, #tpu.memory_space<vmem>>, %arg6: memref<8x128xf32, #tpu.memory_space<vmem>>) attributes {dimension_semantics = [], scalar_prefetch = 0 : i64, scratch_operands = 0 : i64, tpu.core_type = #tpu.core_type<tc>} {
    %c0 = arith.constant 0 : index
    %c0_0 = arith.constant 0 : index
    %0 = vector.load %arg0[%c0, %c0_0] : memref<64x1xi32, #tpu.memory_space<vmem>>, vector<64x1xi32>
    %1 = tpu.iota {dimensions = array<i32: 1>} : vector<64x24xi32>
    %2 = vector.broadcast %0 : vector<64x1xi32> to vector<64x24xi32>
    %3 = arith.cmpi eq, %2, %1 : vector<64x24xi32>
    %4 = arith.extui %3 : vector<64x24xi1> to vector<64x24xi32>
    %5 = arith.sitofp %4 : vector<64x24xi32> to vector<64x24xf32>
    %c0_1 = arith.constant 0 : index
    %c0_2 = arith.constant 0 : index
    %6 = vector.load %arg1[%c0_1, %c0_2] : memref<24x128xf32, #tpu.memory_space<vmem>>, vector<24x128xf32>
    %cst = arith.constant dense<0.000000e+00> : vector<64x128xf32>
    %7 = tpu.matmul %5, %6, %cst {dimension_numbers = #tpu.dot_dimension_numbers<[1], [0], [0], [1], [0, 0, 1, 1], [], []>} : vector<64x24xf32>, vector<24x128xf32>, vector<64x128xf32> -> vector<64x128xf32>
    %c0_3 = arith.constant 0 : index
    %c0_4 = arith.constant 0 : index
    %8 = vector.load %arg3[%c0_3, %c0_4] : memref<1x128xf32, #tpu.memory_space<vmem>>, vector<1x128xf32>
    %9 = vector.broadcast %8 : vector<1x128xf32> to vector<64x128xf32>
    %10 = arith.addf %7, %9 : vector<64x128xf32>
    %c0_5 = arith.constant 0 : index
    %c0_6 = arith.constant 0 : index
    %11 = vector.load %arg2[%c0_5, %c0_6] : memref<32x128xf32, #tpu.memory_space<vmem>>, vector<32x128xf32>
    %cst_7 = arith.constant 0.000000e+00 : f32
    %12 = vector.broadcast %cst_7 : f32 to vector<8x32xf32>
    %cst_8 = arith.constant 0.000000e+00 : f32
    %13 = vector.broadcast %cst_8 : f32 to vector<8x32xf32>
    %14 = vector.extract_strided_slice %10 {offsets = [0, 0], sizes = [8, 128], strides = [1, 1]} : vector<64x128xf32> to vector<8x128xf32>
    %cst_9 = arith.constant dense<0.000000e+00> : vector<8x128xf32>
    %15 = tpu.matmul %12, %11, %cst_9 {dimension_numbers = #tpu.dot_dimension_numbers<[1], [0], [0], [1], [0, 0, 1, 1], [], []>} : vector<8x32xf32>, vector<32x128xf32>, vector<8x128xf32> -> vector<8x128xf32>
    %16 = arith.addf %14, %15 : vector<8x128xf32>
    %17 = arith.negf %16 : vector<8x128xf32>
    %18 = math.exp %17 : vector<8x128xf32>
    %cst_10 = arith.constant 1.000000e+00 : f32
    %19 = vector.broadcast %cst_10 : f32 to vector<8x128xf32>
    %20 = arith.addf %19, %18 : vector<8x128xf32>
    %21 = arith.divf %19, %20 : vector<8x128xf32>
    %22 = math.tanh %16 : vector<8x128xf32>
    %23 = vector.extract_strided_slice %21 {offsets = [0, 0], sizes = [8, 32], strides = [1, 1]} : vector<8x128xf32> to vector<8x32xf32>
    %24 = vector.extract_strided_slice %21 {offsets = [0, 32], sizes = [8, 32], strides = [1, 1]} : vector<8x128xf32> to vector<8x32xf32>
    %25 = vector.extract_strided_slice %22 {offsets = [0, 64], sizes = [8, 32], strides = [1, 1]} : vector<8x128xf32> to vector<8x32xf32>
    %26 = vector.extract_strided_slice %21 {offsets = [0, 96], sizes = [8, 32], strides = [1, 1]} : vector<8x128xf32> to vector<8x32xf32>
    %27 = arith.mulf %24, %13 : vector<8x32xf32>
    %28 = arith.mulf %23, %25 : vector<8x32xf32>
    %29 = arith.addf %27, %28 : vector<8x32xf32>
    %30 = math.tanh %29 : vector<8x32xf32>
    %31 = arith.mulf %26, %30 : vector<8x32xf32>
    %32 = vector.extract_strided_slice %10 {offsets = [8, 0], sizes = [8, 128], strides = [1, 1]} : vector<64x128xf32> to vector<8x128xf32>
    %cst_11 = arith.constant dense<0.000000e+00> : vector<8x128xf32>
    %33 = tpu.matmul %31, %11, %cst_11 {dimension_numbers = #tpu.dot_dimension_numbers<[1], [0], [0], [1], [0, 0, 1, 1], [], []>} : vector<8x32xf32>, vector<32x128xf32>, vector<8x128xf32> -> vector<8x128xf32>
    %34 = arith.addf %32, %33 : vector<8x128xf32>
    %35 = arith.negf %34 : vector<8x128xf32>
    %36 = math.exp %35 : vector<8x128xf32>
    %cst_12 = arith.constant 1.000000e+00 : f32
    %37 = vector.broadcast %cst_12 : f32 to vector<8x128xf32>
    %38 = arith.addf %37, %36 : vector<8x128xf32>
    %39 = arith.divf %37, %38 : vector<8x128xf32>
    %40 = math.tanh %34 : vector<8x128xf32>
    %41 = vector.extract_strided_slice %39 {offsets = [0, 0], sizes = [8, 32], strides = [1, 1]} : vector<8x128xf32> to vector<8x32xf32>
    %42 = vector.extract_strided_slice %39 {offsets = [0, 32], sizes = [8, 32], strides = [1, 1]} : vector<8x128xf32> to vector<8x32xf32>
    %43 = vector.extract_strided_slice %40 {offsets = [0, 64], sizes = [8, 32], strides = [1, 1]} : vector<8x128xf32> to vector<8x32xf32>
    %44 = vector.extract_strided_slice %39 {offsets = [0, 96], sizes = [8, 32], strides = [1, 1]} : vector<8x128xf32> to vector<8x32xf32>
    %45 = arith.mulf %42, %29 : vector<8x32xf32>
    %46 = arith.mulf %41, %43 : vector<8x32xf32>
    %47 = arith.addf %45, %46 : vector<8x32xf32>
    %48 = math.tanh %47 : vector<8x32xf32>
    %49 = arith.mulf %44, %48 : vector<8x32xf32>
    %50 = vector.extract_strided_slice %10 {offsets = [16, 0], sizes = [8, 128], strides = [1, 1]} : vector<64x128xf32> to vector<8x128xf32>
    %cst_13 = arith.constant dense<0.000000e+00> : vector<8x128xf32>
    %51 = tpu.matmul %49, %11, %cst_13 {dimension_numbers = #tpu.dot_dimension_numbers<[1], [0], [0], [1], [0, 0, 1, 1], [], []>} : vector<8x32xf32>, vector<32x128xf32>, vector<8x128xf32> -> vector<8x128xf32>
    %52 = arith.addf %50, %51 : vector<8x128xf32>
    %53 = arith.negf %52 : vector<8x128xf32>
    %54 = math.exp %53 : vector<8x128xf32>
    %cst_14 = arith.constant 1.000000e+00 : f32
    %55 = vector.broadcast %cst_14 : f32 to vector<8x128xf32>
    %56 = arith.addf %55, %54 : vector<8x128xf32>
    %57 = arith.divf %55, %56 : vector<8x128xf32>
    %58 = math.tanh %52 : vector<8x128xf32>
    %59 = vector.extract_strided_slice %57 {offsets = [0, 0], sizes = [8, 32], strides = [1, 1]} : vector<8x128xf32> to vector<8x32xf32>
    %60 = vector.extract_strided_slice %57 {offsets = [0, 32], sizes = [8, 32], strides = [1, 1]} : vector<8x128xf32> to vector<8x32xf32>
    %61 = vector.extract_strided_slice %58 {offsets = [0, 64], sizes = [8, 32], strides = [1, 1]} : vector<8x128xf32> to vector<8x32xf32>
    %62 = vector.extract_strided_slice %57 {offsets = [0, 96], sizes = [8, 32], strides = [1, 1]} : vector<8x128xf32> to vector<8x32xf32>
    %63 = arith.mulf %60, %47 : vector<8x32xf32>
    %64 = arith.mulf %59, %61 : vector<8x32xf32>
    %65 = arith.addf %63, %64 : vector<8x32xf32>
    %66 = math.tanh %65 : vector<8x32xf32>
    %67 = arith.mulf %62, %66 : vector<8x32xf32>
    %68 = vector.extract_strided_slice %10 {offsets = [24, 0], sizes = [8, 128], strides = [1, 1]} : vector<64x128xf32> to vector<8x128xf32>
    %cst_15 = arith.constant dense<0.000000e+00> : vector<8x128xf32>
    %69 = tpu.matmul %67, %11, %cst_15 {dimension_numbers = #tpu.dot_dimension_numbers<[1], [0], [0], [1], [0, 0, 1, 1], [], []>} : vector<8x32xf32>, vector<32x128xf32>, vector<8x128xf32> -> vector<8x128xf32>
    %70 = arith.addf %68, %69 : vector<8x128xf32>
    %71 = arith.negf %70 : vector<8x128xf32>
    %72 = math.exp %71 : vector<8x128xf32>
    %cst_16 = arith.constant 1.000000e+00 : f32
    %73 = vector.broadcast %cst_16 : f32 to vector<8x128xf32>
    %74 = arith.addf %73, %72 : vector<8x128xf32>
    %75 = arith.divf %73, %74 : vector<8x128xf32>
    %76 = math.tanh %70 : vector<8x128xf32>
    %77 = vector.extract_strided_slice %75 {offsets = [0, 0], sizes = [8, 32], strides = [1, 1]} : vector<8x128xf32> to vector<8x32xf32>
    %78 = vector.extract_strided_slice %75 {offsets = [0, 32], sizes = [8, 32], strides = [1, 1]} : vector<8x128xf32> to vector<8x32xf32>
    %79 = vector.extract_strided_slice %76 {offsets = [0, 64], sizes = [8, 32], strides = [1, 1]} : vector<8x128xf32> to vector<8x32xf32>
    %80 = vector.extract_strided_slice %75 {offsets = [0, 96], sizes = [8, 32], strides = [1, 1]} : vector<8x128xf32> to vector<8x32xf32>
    %81 = arith.mulf %78, %65 : vector<8x32xf32>
    %82 = arith.mulf %77, %79 : vector<8x32xf32>
    %83 = arith.addf %81, %82 : vector<8x32xf32>
    %84 = math.tanh %83 : vector<8x32xf32>
    %85 = arith.mulf %80, %84 : vector<8x32xf32>
    %86 = vector.extract_strided_slice %10 {offsets = [32, 0], sizes = [8, 128], strides = [1, 1]} : vector<64x128xf32> to vector<8x128xf32>
    %cst_17 = arith.constant dense<0.000000e+00> : vector<8x128xf32>
    %87 = tpu.matmul %85, %11, %cst_17 {dimension_numbers = #tpu.dot_dimension_numbers<[1], [0], [0], [1], [0, 0, 1, 1], [], []>} : vector<8x32xf32>, vector<32x128xf32>, vector<8x128xf32> -> vector<8x128xf32>
    %88 = arith.addf %86, %87 : vector<8x128xf32>
    %89 = arith.negf %88 : vector<8x128xf32>
    %90 = math.exp %89 : vector<8x128xf32>
    %cst_18 = arith.constant 1.000000e+00 : f32
    %91 = vector.broadcast %cst_18 : f32 to vector<8x128xf32>
    %92 = arith.addf %91, %90 : vector<8x128xf32>
    %93 = arith.divf %91, %92 : vector<8x128xf32>
    %94 = math.tanh %88 : vector<8x128xf32>
    %95 = vector.extract_strided_slice %93 {offsets = [0, 0], sizes = [8, 32], strides = [1, 1]} : vector<8x128xf32> to vector<8x32xf32>
    %96 = vector.extract_strided_slice %93 {offsets = [0, 32], sizes = [8, 32], strides = [1, 1]} : vector<8x128xf32> to vector<8x32xf32>
    %97 = vector.extract_strided_slice %94 {offsets = [0, 64], sizes = [8, 32], strides = [1, 1]} : vector<8x128xf32> to vector<8x32xf32>
    %98 = vector.extract_strided_slice %93 {offsets = [0, 96], sizes = [8, 32], strides = [1, 1]} : vector<8x128xf32> to vector<8x32xf32>
    %99 = arith.mulf %96, %83 : vector<8x32xf32>
    %100 = arith.mulf %95, %97 : vector<8x32xf32>
    %101 = arith.addf %99, %100 : vector<8x32xf32>
    %102 = math.tanh %101 : vector<8x32xf32>
    %103 = arith.mulf %98, %102 : vector<8x32xf32>
    %104 = vector.extract_strided_slice %10 {offsets = [40, 0], sizes = [8, 128], strides = [1, 1]} : vector<64x128xf32> to vector<8x128xf32>
    %cst_19 = arith.constant dense<0.000000e+00> : vector<8x128xf32>
    %105 = tpu.matmul %103, %11, %cst_19 {dimension_numbers = #tpu.dot_dimension_numbers<[1], [0], [0], [1], [0, 0, 1, 1], [], []>} : vector<8x32xf32>, vector<32x128xf32>, vector<8x128xf32> -> vector<8x128xf32>
    %106 = arith.addf %104, %105 : vector<8x128xf32>
    %107 = arith.negf %106 : vector<8x128xf32>
    %108 = math.exp %107 : vector<8x128xf32>
    %cst_20 = arith.constant 1.000000e+00 : f32
    %109 = vector.broadcast %cst_20 : f32 to vector<8x128xf32>
    %110 = arith.addf %109, %108 : vector<8x128xf32>
    %111 = arith.divf %109, %110 : vector<8x128xf32>
    %112 = math.tanh %106 : vector<8x128xf32>
    %113 = vector.extract_strided_slice %111 {offsets = [0, 0], sizes = [8, 32], strides = [1, 1]} : vector<8x128xf32> to vector<8x32xf32>
    %114 = vector.extract_strided_slice %111 {offsets = [0, 32], sizes = [8, 32], strides = [1, 1]} : vector<8x128xf32> to vector<8x32xf32>
    %115 = vector.extract_strided_slice %112 {offsets = [0, 64], sizes = [8, 32], strides = [1, 1]} : vector<8x128xf32> to vector<8x32xf32>
    %116 = vector.extract_strided_slice %111 {offsets = [0, 96], sizes = [8, 32], strides = [1, 1]} : vector<8x128xf32> to vector<8x32xf32>
    %117 = arith.mulf %114, %101 : vector<8x32xf32>
    %118 = arith.mulf %113, %115 : vector<8x32xf32>
    %119 = arith.addf %117, %118 : vector<8x32xf32>
    %120 = math.tanh %119 : vector<8x32xf32>
    %121 = arith.mulf %116, %120 : vector<8x32xf32>
    %122 = vector.extract_strided_slice %10 {offsets = [48, 0], sizes = [8, 128], strides = [1, 1]} : vector<64x128xf32> to vector<8x128xf32>
    %cst_21 = arith.constant dense<0.000000e+00> : vector<8x128xf32>
    %123 = tpu.matmul %121, %11, %cst_21 {dimension_numbers = #tpu.dot_dimension_numbers<[1], [0], [0], [1], [0, 0, 1, 1], [], []>} : vector<8x32xf32>, vector<32x128xf32>, vector<8x128xf32> -> vector<8x128xf32>
    %124 = arith.addf %122, %123 : vector<8x128xf32>
    %125 = arith.negf %124 : vector<8x128xf32>
    %126 = math.exp %125 : vector<8x128xf32>
    %cst_22 = arith.constant 1.000000e+00 : f32
    %127 = vector.broadcast %cst_22 : f32 to vector<8x128xf32>
    %128 = arith.addf %127, %126 : vector<8x128xf32>
    %129 = arith.divf %127, %128 : vector<8x128xf32>
    %130 = math.tanh %124 : vector<8x128xf32>
    %131 = vector.extract_strided_slice %129 {offsets = [0, 0], sizes = [8, 32], strides = [1, 1]} : vector<8x128xf32> to vector<8x32xf32>
    %132 = vector.extract_strided_slice %129 {offsets = [0, 32], sizes = [8, 32], strides = [1, 1]} : vector<8x128xf32> to vector<8x32xf32>
    %133 = vector.extract_strided_slice %130 {offsets = [0, 64], sizes = [8, 32], strides = [1, 1]} : vector<8x128xf32> to vector<8x32xf32>
    %134 = vector.extract_strided_slice %129 {offsets = [0, 96], sizes = [8, 32], strides = [1, 1]} : vector<8x128xf32> to vector<8x32xf32>
    %135 = arith.mulf %132, %119 : vector<8x32xf32>
    %136 = arith.mulf %131, %133 : vector<8x32xf32>
    %137 = arith.addf %135, %136 : vector<8x32xf32>
    %138 = math.tanh %137 : vector<8x32xf32>
    %139 = arith.mulf %134, %138 : vector<8x32xf32>
    %140 = vector.extract_strided_slice %10 {offsets = [56, 0], sizes = [8, 128], strides = [1, 1]} : vector<64x128xf32> to vector<8x128xf32>
    %cst_23 = arith.constant dense<0.000000e+00> : vector<8x128xf32>
    %141 = tpu.matmul %139, %11, %cst_23 {dimension_numbers = #tpu.dot_dimension_numbers<[1], [0], [0], [1], [0, 0, 1, 1], [], []>} : vector<8x32xf32>, vector<32x128xf32>, vector<8x128xf32> -> vector<8x128xf32>
    %142 = arith.addf %140, %141 : vector<8x128xf32>
    %143 = arith.negf %142 : vector<8x128xf32>
    %144 = math.exp %143 : vector<8x128xf32>
    %cst_24 = arith.constant 1.000000e+00 : f32
    %145 = vector.broadcast %cst_24 : f32 to vector<8x128xf32>
    %146 = arith.addf %145, %144 : vector<8x128xf32>
    %147 = arith.divf %145, %146 : vector<8x128xf32>
    %148 = math.tanh %142 : vector<8x128xf32>
    %149 = vector.extract_strided_slice %147 {offsets = [0, 0], sizes = [8, 32], strides = [1, 1]} : vector<8x128xf32> to vector<8x32xf32>
    %150 = vector.extract_strided_slice %147 {offsets = [0, 32], sizes = [8, 32], strides = [1, 1]} : vector<8x128xf32> to vector<8x32xf32>
    %151 = vector.extract_strided_slice %148 {offsets = [0, 64], sizes = [8, 32], strides = [1, 1]} : vector<8x128xf32> to vector<8x32xf32>
    %152 = vector.extract_strided_slice %147 {offsets = [0, 96], sizes = [8, 32], strides = [1, 1]} : vector<8x128xf32> to vector<8x32xf32>
    %153 = arith.mulf %150, %137 : vector<8x32xf32>
    %154 = arith.mulf %149, %151 : vector<8x32xf32>
    %155 = arith.addf %153, %154 : vector<8x32xf32>
    %156 = math.tanh %155 : vector<8x32xf32>
    %157 = arith.mulf %152, %156 : vector<8x32xf32>
    %c0_25 = arith.constant 0 : index
    %c0_26 = arith.constant 0 : index
    %158 = vector.load %arg4[%c0_25, %c0_26] : memref<32x128xf32, #tpu.memory_space<vmem>>, vector<32x128xf32>
    %cst_27 = arith.constant dense<0.000000e+00> : vector<8x128xf32>
    %159 = tpu.matmul %157, %158, %cst_27 {dimension_numbers = #tpu.dot_dimension_numbers<[1], [0], [0], [1], [0, 0, 1, 1], [], []>} : vector<8x32xf32>, vector<32x128xf32>, vector<8x128xf32> -> vector<8x128xf32>
    %c0_28 = arith.constant 0 : index
    %c0_29 = arith.constant 0 : index
    %160 = vector.load %arg5[%c0_28, %c0_29] : memref<1x128xf32, #tpu.memory_space<vmem>>, vector<1x128xf32>
    %161 = vector.broadcast %160 : vector<1x128xf32> to vector<8x128xf32>
    %162 = arith.addf %159, %161 : vector<8x128xf32>
    %c0_30 = arith.constant 0 : index
    %c0_31 = arith.constant 0 : index
    %163 = vector.load %arg6[%c0_30, %c0_31] : memref<8x128xf32, #tpu.memory_space<vmem>>, vector<8x128xf32>
    tpu.vector_store %arg6[%c0_30, %c0_31], %162 {strides = array<i32>} : memref<8x128xf32, #tpu.memory_space<vmem>>, vector<8x128xf32>,
    return
  }
}

</mosaic_0001>

<bundles_post_ra>
// kernel: tpu_custom_call.1
= control target key start
LH: loop header
LB: loop body
LE: loop exit
PB: predicated region body
PF: predicated region fallthrough
CT: control target
= control target key end

     0   :  { %11 = vsyncpa [#allocation3], 0  ;;  %s1758_s0 = inlined_call_operand.vmem [shape: s32[64,1], index: 0, kind: input, shape index: {}]   ;;  %s1759_s1 = inlined_call_operand.hbm [shape: f32[24,128], index: 1, kind: input, shape index: {}]   ;;  %s1760_s2 = inlined_call_operand.vmem [shape: f32[32,128], index: 2, kind: input, shape index: {}]   ;;  %s1761_s3 = inlined_call_operand.vmem [shape: f32[1,128], index: 3, kind: input, shape index: {}]   ;;  %s1762_s4 = inlined_call_operand.vmem [shape: f32[32,128], index: 4, kind: input, shape index: {}]   ;;  %s1763_s5 = inlined_call_operand.vmem [shape: f32[1,128], index: 5, kind: input, shape index: {}]   ;;  %s1764_s6 = inlined_call_operand.hbm [shape: f32[8,128], index: 6, kind: output, shape index: {}]  }
   0x1   :  { %12 = vsyncpa [#allocation4], 0  ;;  %s1467_s21 = smov [#allocation2]  }
   0x2   :  { %s20_s22 = sshll.u32 %s1467_s21, 4  ;;  %s21_s22 = int_to_ptr.vmem [resolvable:$true] %s20_s22 }
   0x3   :  { %s1431_s23 = scalar_lea.vmem %s21_s22, 384  ;;  %p1436_p1 = scmp.lt.s32.totalorder %s21_s22, %s21_s22 }
   0x4   :  { %p1432_p0 = scmp.ne.s32.totalorder %s21_s22, %s1431_s23  ;;  %p1437_p2 = scmp.lt.s32.totalorder %s1431_s23, %s1431_s23 }
   0x6   :  { %p1438_p3 = por %p1437_p2, %p1436_p1 }
   0x8   :  { %p1439_p4 = pnand %p1438_p3, %p1432_p0 }
   0xa   :  { %1442 = shalt.err (!%p1439_p4)
}
   0xb   :  { %s1468_s24 = smov 128   ;;  %s1469_s25 = smov 8  }
   0xc   :  { %26 = dma.hbm_to_vmem [thread:$0]  %s1759_s1, 384, %s21_s22, [#allocation3], %s1468_s24, %s1468_s24, %s1469_s25  }
   0xd   :  { %1463 = dma.done.wait [#allocation3], 384  }
   0xe   :  { %1464 = vsyncadd [#allocation3], 4294966912  ;;  %v1470_v0 = vmov 0   ;;  %v1471_v1 = vmov 0.0   ;;  %v38_v2 = vld [vmem:[%s1758_s0] sm:$0xff]  ;;  %v98_v3 = vld [vmem:[#allocation2 + $0x10] sm:$0xff]  ;;  %v46_v11 = vlaneseq }
   0xf   :  { %1357 = vset.pattern.permute.xlu0 %v1470_v0  ;;  %1358 = vset.pattern.permute.xlu1 %v1470_v0  ;;  %v1521_v4 = vld [vmem:[%s1760_s2 + $0x18] sm:$0xff]  ;;  %v97_v5 = vld [vmem:[#allocation2 + $0x8] sm:$0xff]  ;;  %v1526_v6 = vld [vmem:[%s1760_s2 + $0x10] sm:$0xff]  ;;  %vm1472_vm0 = vmmov 0   ;;  %vm106_vm1 = vcmask 195584   ;;  %s1473_s16 = smov 64  }
  0x10   :  { %1249 = vmatprep.subr.mxu1 %v1471_v1  ;;  %49 = vperm.xlu0 %1357, %v38_v2   ;;  %v39_v7 = vld [vmem:[%s1758_s0 + $0x8] sm:$0xff]  ;;  %v96_v8 = vld [vmem:[#allocation2] sm:$0xff]  ;;  %v1563_v12 = vand.u32 127, %v46_v11  ;;  %s1474_s17 = smov 32   ;;  %vm240_vm4 = vcmask 261120   ;;  %v40_v49 = vld [vmem:[%s1758_s0 + $0x10] sm:$0xff] }
  0x11   :  { %1231 = vmatprep.subr.mxu0 %v98_v3  ;;  %1250 = vmatpush3.msra.mxu1 %v1521_v4  ;;  %v1537_v9 = vld [vmem:[%s1760_s2 + $0x8] sm:$0xff]  ;;  %v1543_v10 = vld [vmem:[%s1760_s2] sm:$0xff]  ;;  %v44_v51 = vld [vmem:[%s1758_s0 + $0x30] sm:$0xff]  ;;  %s1475_s13 = smov [#allocation5]  }
  0x12   :  { %1232 = vmatpush3.msra.mxu0 %v98_v3  ;;  %1251 = vmatprep.subr.mxu1 %v1471_v1  ;;  %v1582_v20 = vld [vmem:[%s1761_s3] ss:$0 sm:$0xff]  ;;  %v41_v58 = vld [vmem:[%s1758_s0 + $0x18] sm:$0xff]  ;;  %v43_v59 = vld [vmem:[%s1758_s0 + $0x28] sm:$0xff] }
  0x13   :  { %1233 = vmatprep.subr.mxu0 %v97_v5  ;;  %1252 = vmatpush3.msra.mxu1 %v1526_v6  ;;  %v42_v50 = vld [vmem:[%s1758_s0 + $0x20] sm:$0xff]  ;;  %v45_v60 = vld [vmem:[%s1758_s0 + $0x38] sm:$0xff] }
  0x14   :  { %1234 = vmatpush3.msra.mxu0 %v97_v5  ;;  %52 = vperm.xlu0 %1357, %v39_v7  }
  0x15   :  { %1235 = vmatprep.subr.mxu0 %v96_v8  ;;  %1253 = vmatprep.subr.mxu1 %v1471_v1 }
  0x16   :  { %1236 = vmatpush3.msra.mxu0 %v96_v8  ;;  %1254 = vmatpush3.msra.mxu1 %v1537_v9 }
  0x17   :  { %1257 = vmatprep.mubr.msk.f32.mxu1 %vm1472_vm0, %v1471_v1  ;;  %1255 = vmatprep.subr.mxu1 %v1471_v1 }
  0x18   :  { %1271 = vmatprep.subr.mxu0 %v1471_v1  ;;  %1256 = vmatpush3.msra.mxu1 %v1543_v10 }
  0x19   :  { %1258 = vmatmul.mubr.f32.vlgmr.msra.gmra.mxu1 %v1471_v1  ;;  %1260 = vmatprep.subr.mxu1 %v1471_v1 }
  0x1a   :  { %1261 = vmatpush3.msra.mxu1 %v1521_v4  ;;  %1268 = vmatprep.mubr.msk.f32.mxu1 %vm1472_vm0, %v1471_v1 }
  0x1b   :  { %1262 = vmatprep.subr.mxu1 %v1471_v1 }
  0x1c   :  { %1263 = vmatpush3.msra.mxu1 %v1526_v6 }
  0x1d   :  { %1264 = vmatprep.subr.mxu1 %v1471_v1 }
  0x1e   :  { %1265 = vmatpush3.msra.mxu1 %v1537_v9 }
  0x1f   :  { %1266 = vmatprep.subr.mxu1 %v1471_v1 }
  0x20   :  { %1267 = vmatpush3.msra.mxu1 %v1543_v10 }
  0x21   :  { %1282 = vmatprep.subr.mxu1 %v1471_v1 }
  0x8b   :  { %v50_v13 = vpop.permute.xlu0 %49 }
  0x8c   :  { %vm72_vm2 = vcmp.eq.s32.totalorder %v50_v13, %v1563_v12 }
  0x8d   :  { %v1141_v14 = vsel %vm72_vm2, 1.0, %v1471_v1 }
  0x8e   :  { %1237 = vmatprep.mubr.msk.f32.mxu0 %vm106_vm1, %v1141_v14 }
  0x8f   :  { %v53_v15 = vpop.permute.xlu0 %52 }
  0x90   :  { %vm73_vm3 = vcmp.eq.s32.totalorder %v53_v15, %v1563_v12 }
  0x91   :  { %v1142_v16 = vsel %vm73_vm3, 1.0, %v1471_v1 }
  0x92   :  { %1238 = vmatmul.mubr.msk.f32.vlgmr.msra.gmra.mxu0 %vm106_vm1, %v1142_v16 }
  0x93   :  { %1272 = vmatpush3.msra.mxu0 %v1521_v4 }
  0x94   :  { %1273 = vmatprep.subr.mxu0 %v1471_v1 }
  0x95   :  { %1274 = vmatpush3.msra.mxu0 %v1526_v6 }
  0x96   :  { %1275 = vmatprep.subr.mxu0 %v1471_v1 }
  0x97   :  { %1276 = vmatpush3.msra.mxu0 %v1537_v9 }
  0x98   :  { %1277 = vmatprep.subr.mxu0 %v1471_v1 }
  0x99   :  { %1278 = vmatpush3.msra.mxu0 %v1543_v10 }
  0x9a   :  { %1293 = vmatprep.subr.mxu0 %v1471_v1 }
  0xd9   :  { %v310_v17 = vpop.f32.mrf.mxu1 }
  0xdb   :  { %v1259_v18 = vpop.f32.mrf.mxu1 }
 0x152   :  { %v1239_v19 = vpop.f32.mrf.mxu0 }
 0x153   :  { %v203_v38 = vadd.f32 %v1239_v19, %v1582_v20 }
 0x154   :  { %v197_v21 = vpop.f32.mrf.mxu0 }
 0x155   :  { %v198_v22 = vadd.f32 %v1582_v20, %v197_v21 }
 0x157   :  { %v314_v23 = vadd.f32 %v310_v17, %v198_v22 }
 0x159   :  { %1359 = vtanh.f32 %v314_v23  ;;  %v1158_v25 = vmul.f32 -1.442695, %v314_v23 }
 0x15b   :  { %1361 = vpow2.f32 %v1158_v25 }
 0x166   :  { %v1360_v24 = vpop.eup %1359 }
 0x167   :  { %324 = vrot.lane.b32.xlu1 %v1360_v24, %s1473_s16 }
 0x168   :  { %v1362_v26 = vpop.eup %1361 }
 0x169   :  { %v318_v27 = vadd.f32 1.0, %v1362_v26 }
 0x16b   :  { %1363 = vrcp.f32 %v318_v27 }
 0x178   :  { %v1364_v28 = vpop.eup %1363 }
 0x179   :  { %v322_v31 = vmul.f32 0.0, %v1364_v28 }
 0x1d9   :  { %v325_v29 = vpop.permute.xlu1 %324 }
 0x1da   :  { %v327_v30 = vmul.f32 %v1364_v28, %v325_v29 }
 0x1dc   :  { %329 = vrot.lane.b32.xlu1 %v327_v30, %s1474_s17 }
 0x24e   :  { %v330_v32 = vpop.permute.xlu1 %329 }
 0x24f   :  { %v332_v33 = vadd.f32 %v330_v32, %v322_v31 }
 0x251   :  { %1365 = vtanh.f32 %v332_v33 }
 0x25e   :  { %v1366_v34 = vpop.eup %1365 }
 0x25f   :  { %335 = vrot.lane.b32.xlu0 %v1366_v34, %s1473_s16 }
 0x2d1   :  { %v336_v35 = vpop.permute.xlu0 %335 }
 0x2d2   :  { %v338_v36 = vmul.f32 %v1364_v28, %v336_v35 }
 0x2d4   :  { %340 = vrot.lane.b32.xlu1 %v338_v36, %s1474_s17 }
 0x346   :  { %v341_v37 = vpop.permute.xlu1 %340 }
 0x347   :  { %1269 = vmatmul.mubr.msk.f32.vlgmr.msra.gmra.mxu1 %vm240_vm4, %v341_v37 }
 0x348   :  { %1283 = vmatpush3.msra.mxu1 %v1521_v4  ;;  %1290 = vmatprep.mubr.msk.f32.mxu1 %vm1472_vm0, %v1471_v1 }
 0x349   :  { %1284 = vmatprep.subr.mxu1 %v1471_v1 }
 0x34a   :  { %1285 = vmatpush3.msra.mxu1 %v1526_v6 }
 0x34b   :  { %1286 = vmatprep.subr.mxu1 %v1471_v1 }
 0x34c   :  { %1287 = vmatpush3.msra.mxu1 %v1537_v9 }
 0x34d   :  { %1288 = vmatprep.subr.mxu1 %v1471_v1 }
 0x34e   :  { %1289 = vmatpush3.msra.mxu1 %v1543_v10 }
 0x34f   :  { %1304 = vmatprep.subr.mxu1 %v1471_v1 }
 0x407   :  { %v410_v39 = vpop.f32.mrf.mxu1 }
 0x408   :  { %v414_v40 = vadd.f32 %v410_v39, %v203_v38 }
 0x409   :  { %v1270_v41 = vpop.f32.mrf.mxu1 }
 0x40a   :  { %1367 = vtanh.f32 %v414_v40  ;;  %v1160_v43 = vmul.f32 -1.442695, %v414_v40 }
 0x40c   :  { %1369 = vpow2.f32 %v1160_v43 }
 0x417   :  { %v1368_v42 = vpop.eup %1367 }
 0x418   :  { %424 = vrot.lane.b32.xlu0 %v1368_v42, %s1473_s16 }
 0x419   :  { %v1370_v44 = vpop.eup %1369 }
 0x41a   :  { %v418_v45 = vadd.f32 1.0, %v1370_v44 }
 0x41c   :  { %1371 = vrcp.f32 %v418_v45 }
 0x429   :  { %v1372_v46 = vpop.eup %1371 }
 0x42a   :  { %v422_v52 = vmul.f32 %v1372_v46, %v332_v33 }
 0x48a   :  { %v425_v47 = vpop.permute.xlu0 %424 }
 0x48b   :  { %v427_v48 = vmul.f32 %v1372_v46, %v425_v47 }
 0x48d   :  { %429 = vrot.lane.b32.xlu1 %v427_v48, %s1474_s17 }
 0x491   :  { %55 = vperm.xlu1 %1358, %v40_v49  }
 0x495   :  { %61 = vperm.xlu1 %1358, %v42_v50  }
 0x499   :  { %67 = vperm.xlu1 %1358, %v44_v51  }
 0x4ff   :  { %v430_v53 = vpop.permute.xlu1 %429 }
 0x500   :  { %v1612_v54 = vadd.f32 %v430_v53, %v422_v52 }
 0x502   :  { %1373 = vtanh.f32 %v1612_v54 }
 0x50c   :  { %v56_v55 = vpop.permute.xlu1 %55 }
 0x50d   :  { %vm74_vm5 = vcmp.eq.s32.totalorder %v56_v55, %v1563_v12 }
 0x50e   :  { %v1143_v56 = vsel %vm74_vm5, 1.0, %v1471_v1 }
 0x50f   :  { %v1374_v57 = vpop.eup %1373  ;;  %1240 = vmatprep.mubr.msk.f32.mxu0 %vm106_vm1, %v1143_v56 }
 0x510   :  { %435 = vrot.lane.b32.xlu0 %v1374_v57, %s1473_s16  ;;  %v62_v63 = vpop.permute.xlu1 %61 }
 0x511   :  { %vm76_vm6 = vcmp.eq.s32.totalorder %v62_v63, %v1563_v12 }
 0x512   :  { %v1145_v3 = vsel %vm76_vm6, 1.0, %v1471_v1 }
 0x514   :  { %58 = vperm.xlu0 %1357, %v41_v58   ;;  %v68_v0 = vpop.permute.xlu1 %67 }
 0x515   :  { %vm78_vm8 = vcmp.eq.s32.totalorder %v68_v0, %v1563_v12 }
 0x516   :  { %v1147_v8 = vsel %vm78_vm8, 1.0, %v1471_v1 }
 0x518   :  { %64 = vperm.xlu0 %1357, %v43_v59  }
 0x51c   :  { %70 = vperm.xlu0 %1357, %v45_v60  }
 0x582   :  { %v436_v61 = vpop.permute.xlu0 %435 }
 0x583   :  { %v438_v62 = vmul.f32 %v1372_v46, %v436_v61 }
 0x585   :  { %440 = vrot.lane.b32.xlu1 %v438_v62, %s1474_s17 }
 0x58f   :  { %v59_v2 = vpop.permute.xlu0 %58 }
 0x590   :  { %vm75_vm7 = vcmp.eq.s32.totalorder %v59_v2, %v1563_v12 }
 0x591   :  { %v1144_v5 = vsel %vm75_vm7, 1.0, %v1471_v1 }
 0x592   :  { %1241 = vmatmul.mubr.msk.f32.gmra.mxu0 %vm106_vm1, %v1144_v5 }
 0x593   :  { %v65_v7 = vpop.permute.xlu0 %64  ;;  %1243 = vmatprep.mubr.msk.f32.mxu0 %vm106_vm1, %v1145_v3 }
 0x594   :  { %vm77_vm9 = vcmp.eq.s32.totalorder %v65_v7, %v1563_v12 }
 0x595   :  { %v1146_v11 = vsel %vm77_vm9, 1.0, %v1471_v1 }
 0x596   :  { %1244 = vmatmul.mubr.msk.f32.gmra.mxu0 %vm106_vm1, %v1146_v11 }
 0x597   :  { %v71_v13 = vpop.permute.xlu0 %70  ;;  %1246 = vmatprep.mubr.msk.f32.mxu0 %vm106_vm1, %v1147_v8 }
 0x598   :  { %vm79_vm10 = vcmp.eq.s32.totalorder %v71_v13, %v1563_v12 }
 0x599   :  { %v1148_v14 = vsel %vm79_vm10, 1.0, %v1471_v1 }
 0x59a   :  { %1247 = vmatmul.mubr.msk.f32.gmra.mxu0 %vm106_vm1, %v1148_v14 }
 0x59b   :  { %1279 = vmatprep.mubr.msk.f32.mxu0 %vm1472_vm0, %v1471_v1 }
 0x5f7   :  { %v441_v15 = vpop.permute.xlu1 %440 }
 0x5f8   :  { %1280 = vmatmul.mubr.msk.f32.vlgmr.msra.gmra.mxu0 %vm240_vm4, %v441_v15 }
 0x5f9   :  { %1294 = vmatpush3.msra.mxu0 %v1521_v4  ;;  %1301 = vmatprep.mubr.msk.f32.mxu0 %vm1472_vm0, %v1471_v1 }
 0x5fa   :  { %1295 = vmatprep.subr.mxu0 %v1471_v1 }
 0x5fb   :  { %1296 = vmatpush3.msra.mxu0 %v1526_v6 }
 0x5fc   :  { %1297 = vmatprep.subr.mxu0 %v1471_v1 }
 0x5fd   :  { %1298 = vmatpush3.msra.mxu0 %v1537_v9 }
 0x5fe   :  { %1299 = vmatprep.subr.mxu0 %v1471_v1 }
 0x5ff   :  { %1300 = vmatpush3.msra.mxu0 %v1543_v10 }
 0x600   :  { %1315 = vmatprep.subr.mxu0 %v1471_v1 }
 0x652   :  { %v1242_v12 = vpop.f32.mrf.mxu0 }
 0x653   :  { %v213_v40 = vadd.f32 %v1242_v12, %v1582_v20 }
 0x654   :  { %v207_v16 = vpop.f32.mrf.mxu0 }
 0x655   :  { %v208_v22 = vadd.f32 %v1582_v20, %v207_v16 }
 0x656   :  { %v1657_v17 = vpop.f32.mrf.mxu0 }
 0x658   :  { %v1659_v18 = vpop.f32.mrf.mxu0 }
 0x659   :  { %v218_v58 = vadd.f32 %v1582_v20, %v1659_v18  ;;  %v223_v18 = vadd.f32 %v1657_v17, %v1582_v20 }
 0x65a   :  { %v1661_v19 = vpop.f32.mrf.mxu0 }
 0x65c   :  { %v1663_v21 = vpop.f32.mrf.mxu0 }
 0x6b8   :  { %v510_v23 = vpop.f32.mrf.mxu0 }
 0x6b9   :  { %v514_v24 = vadd.f32 %v510_v23, %v208_v22 }
 0x6ba   :  { %v1281_v25 = vpop.f32.mrf.mxu0 }
 0x6bb   :  { %1375 = vtanh.f32 %v514_v24  ;;  %v1162_v27 = vmul.f32 -1.442695, %v514_v24 }
 0x6bd   :  { %1377 = vpow2.f32 %v1162_v27 }
 0x6c8   :  { %v1376_v26 = vpop.eup %1375 }
 0x6c9   :  { %524 = vrot.lane.b32.xlu0 %v1376_v26, %s1473_s16 }
 0x6ca   :  { %v1378_v28 = vpop.eup %1377 }
 0x6cb   :  { %v518_v29 = vadd.f32 1.0, %v1378_v28 }
 0x6cd   :  { %1379 = vrcp.f32 %v518_v29 }
 0x6da   :  { %v1380_v30 = vpop.eup %1379 }
 0x6db   :  { %v522_v33 = vmul.f32 %v1380_v30, %v1612_v54 }
 0x73b   :  { %v525_v31 = vpop.permute.xlu0 %524 }
 0x73c   :  { %v527_v32 = vmul.f32 %v1380_v30, %v525_v31 }
 0x73e   :  { %529 = vrot.lane.b32.xlu1 %v527_v32, %s1474_s17 }
 0x7b0   :  { %v530_v34 = vpop.permute.xlu1 %529 }
 0x7b1   :  { %v532_v35 = vadd.f32 %v530_v34, %v522_v33  ;;  %v228_v34 = vadd.f32 %v1582_v20, %v1663_v21 }
 0x7b3   :  { %1381 = vtanh.f32 %v532_v35 }
 0x7c0   :  { %v1382_v36 = vpop.eup %1381 }
 0x7c1   :  { %535 = vrot.lane.b32.xlu0 %v1382_v36, %s1473_s16 }
 0x833   :  { %v536_v37 = vpop.permute.xlu0 %535 }
 0x834   :  { %v538_v38 = vmul.f32 %v1380_v30, %v536_v37 }
 0x836   :  { %540 = vrot.lane.b32.xlu1 %v538_v38, %s1474_s17 }
 0x8a8   :  { %v541_v39 = vpop.permute.xlu1 %540 }
 0x8a9   :  { %1291 = vmatmul.mubr.msk.f32.vlgmr.msra.gmra.mxu1 %vm240_vm4, %v541_v39 }
 0x8aa   :  { %1305 = vmatpush3.msra.mxu1 %v1521_v4  ;;  %1312 = vmatprep.mubr.msk.f32.mxu1 %vm1472_vm0, %v1471_v1 }
 0x8ab   :  { %1306 = vmatprep.subr.mxu1 %v1471_v1 }
 0x8ac   :  { %1307 = vmatpush3.msra.mxu1 %v1526_v6 }
 0x8ad   :  { %1308 = vmatprep.subr.mxu1 %v1471_v1 }
 0x8ae   :  { %1309 = vmatpush3.msra.mxu1 %v1537_v9 }
 0x8af   :  { %1310 = vmatprep.subr.mxu1 %v1471_v1 }
 0x8b0   :  { %1311 = vmatpush3.msra.mxu1 %v1543_v10 }
 0x8b1   :  { %1326 = vmatprep.subr.mxu1 %v1471_v1 }
 0x969   :  { %v610_v41 = vpop.f32.mrf.mxu1 }
 0x96a   :  { %v614_v42 = vadd.f32 %v610_v41, %v213_v40 }
 0x96b   :  { %v1292_v43 = vpop.f32.mrf.mxu1 }
 0x96c   :  { %1383 = vtanh.f32 %v614_v42  ;;  %v1164_v45 = vmul.f32 -1.442695, %v614_v42 }
 0x96e   :  { %1385 = vpow2.f32 %v1164_v45 }
 0x979   :  { %v1384_v44 = vpop.eup %1383 }
 0x97a   :  { %624 = vrot.lane.b32.xlu0 %v1384_v44, %s1473_s16 }
 0x97b   :  { %v1386_v46 = vpop.eup %1385 }
 0x97c   :  { %v618_v47 = vadd.f32 1.0, %v1386_v46 }
 0x97e   :  { %1387 = vrcp.f32 %v618_v47 }
 0x98b   :  { %v1388_v48 = vpop.eup %1387 }
 0x98c   :  { %v622_v51 = vmul.f32 %v1388_v48, %v532_v35 }
 0x9ec   :  { %v625_v49 = vpop.permute.xlu0 %624 }
 0x9ed   :  { %v627_v50 = vmul.f32 %v1388_v48, %v625_v49 }
 0x9ef   :  { %629 = vrot.lane.b32.xlu1 %v627_v50, %s1474_s17 }
 0xa61   :  { %v630_v52 = vpop.permute.xlu1 %629 }
 0xa62   :  { %v632_v53 = vadd.f32 %v630_v52, %v622_v51  ;;  %v233_v51 = vadd.f32 %v1661_v19, %v1582_v20  ;;  %v1042_v19 = vld [vmem:[%s1762_s4 + $0x18] sm:$0xff] }
 0xa64   :  { %1389 = vtanh.f32 %v632_v53 }
 0xa71   :  { %v1390_v54 = vpop.eup %1389 }
 0xa72   :  { %635 = vrot.lane.b32.xlu0 %v1390_v54, %s1473_s16 }
 0xae4   :  { %v636_v55 = vpop.permute.xlu0 %635 }
 0xae5   :  { %v638_v56 = vmul.f32 %v1388_v48, %v636_v55 }
 0xae7   :  { %640 = vrot.lane.b32.xlu1 %v638_v56, %s1474_s17 }
 0xb59   :  { %v641_v57 = vpop.permute.xlu1 %640 }
 0xb5a   :  { %1302 = vmatmul.mubr.msk.f32.vlgmr.msra.gmra.mxu0 %vm240_vm4, %v641_v57 }
 0xb5b   :  { %1316 = vmatpush3.msra.mxu0 %v1521_v4  ;;  %1323 = vmatprep.mubr.msk.f32.mxu0 %vm1472_vm0, %v1471_v1 }
 0xb5c   :  { %1317 = vmatprep.subr.mxu0 %v1471_v1 }
 0xb5d   :  { %1318 = vmatpush3.msra.mxu0 %v1526_v6 }
 0xb5e   :  { %1319 = vmatprep.subr.mxu0 %v1471_v1 }
 0xb5f   :  { %1320 = vmatpush3.msra.mxu0 %v1537_v9 }
 0xb60   :  { %1321 = vmatprep.subr.mxu0 %v1471_v1 }
 0xb61   :  { %1322 = vmatpush3.msra.mxu0 %v1543_v10 }
 0xb62   :  { %1337 = vmatprep.subr.mxu0 %v1471_v1 }
 0xc1a   :  { %v710_v59 = vpop.f32.mrf.mxu0 }
 0xc1b   :  { %v714_v60 = vadd.f32 %v710_v59, %v218_v58 }
 0xc1c   :  { %v1303_v61 = vpop.f32.mrf.mxu0 }
 0xc1d   :  { %1391 = vtanh.f32 %v714_v60  ;;  %v1166_v63 = vmul.f32 -1.442695, %v714_v60 }
 0xc1f   :  { %1393 = vpow2.f32 %v1166_v63 }
 0xc2a   :  { %v1392_v62 = vpop.eup %1391 }
 0xc2b   :  { %724 = vrot.lane.b32.xlu0 %v1392_v62, %s1473_s16 }
 0xc2c   :  { %v1394_v0 = vpop.eup %1393 }
 0xc2d   :  { %v718_v2 = vadd.f32 1.0, %v1394_v0  ;;  %v1041_v0 = vld [vmem:[%s1762_s4 + $0x10] sm:$0xff] }
 0xc2f   :  { %1395 = vrcp.f32 %v718_v2  ;;  %v1040_v2 = vld [vmem:[%s1762_s4 + $0x8] sm:$0xff] }
 0xc3c   :  { %v1396_v3 = vpop.eup %1395 }
 0xc3d   :  { %v722_v8 = vmul.f32 %v1396_v3, %v632_v53 }
 0xc9d   :  { %v725_v5 = vpop.permute.xlu0 %724 }
 0xc9e   :  { %v727_v7 = vmul.f32 %v1396_v3, %v725_v5 }
 0xca0   :  { %729 = vrot.lane.b32.xlu1 %v727_v7, %s1474_s17 }
 0xd12   :  { %v730_v11 = vpop.permute.xlu1 %729 }
 0xd13   :  { %v732_v13 = vadd.f32 %v730_v11, %v722_v8 }
 0xd15   :  { %1397 = vtanh.f32 %v732_v13 }
 0xd22   :  { %v1398_v14 = vpop.eup %1397 }
 0xd23   :  { %735 = vrot.lane.b32.xlu0 %v1398_v14, %s1473_s16 }
 0xd95   :  { %v736_v15 = vpop.permute.xlu0 %735 }
 0xd96   :  { %v738_v12 = vmul.f32 %v1396_v3, %v736_v15  ;;  %v1039_v3 = vld [vmem:[%s1762_s4] sm:$0xff]  ;;  %s1132_s4 = sshll.u32 %s1475_s13, 4  ;;  %s1133_s4 = int_to_ptr.vmem [resolvable:$true] %s1132_s4 }
 0xd97   :  { %s1443_s14 = scalar_lea.vmem %s1133_s4, 128  ;;  %p1448_p6 = scmp.lt.s32.totalorder %s1133_s4, %s1133_s4 }
 0xd98   :  { %740 = vrot.lane.b32.xlu1 %v738_v12, %s1474_s17  ;;  %p1444_p5 = scmp.ne.s32.totalorder %s1133_s4, %s1443_s14  ;;  %p1449_p7 = scmp.lt.s32.totalorder %s1443_s14, %s1443_s14 }
 0xd9a   :  { %p1450_p8 = por %p1449_p7, %p1448_p6 }
 0xd9c   :  { %p1451_p9 = pnand %p1450_p8, %p1444_p5 }
 0xe0a   :  { %v741_v16 = vpop.permute.xlu1 %740 }
 0xe0b   :  { %1313 = vmatmul.mubr.msk.f32.vlgmr.msra.gmra.mxu1 %vm240_vm4, %v741_v16 }
 0xe0c   :  { %1327 = vmatpush3.msra.mxu1 %v1521_v4  ;;  %1334 = vmatprep.mubr.msk.f32.mxu1 %vm1472_vm0, %v1471_v1 }
 0xe0d   :  { %1328 = vmatprep.subr.mxu1 %v1471_v1 }
 0xe0e   :  { %1329 = vmatpush3.msra.mxu1 %v1526_v6 }
 0xe0f   :  { %1330 = vmatprep.subr.mxu1 %v1471_v1 }
 0xe10   :  { %1331 = vmatpush3.msra.mxu1 %v1537_v9 }
 0xe11   :  { %1332 = vmatprep.subr.mxu1 %v1471_v1 }
 0xe12   :  { %1333 = vmatpush3.msra.mxu1 %v1543_v10 }
 0xecb   :  { %v810_v22 = vpop.f32.mrf.mxu1 }
 0xecc   :  { %v814_v4 = vadd.f32 %v810_v22, %v223_v18 }
 0xecd   :  { %v1314_v23 = vpop.f32.mrf.mxu1 }
 0xece   :  { %1399 = vtanh.f32 %v814_v4  ;;  %v1168_v25 = vmul.f32 -1.442695, %v814_v4 }
 0xed0   :  { %1401 = vpow2.f32 %v1168_v25 }
 0xedb   :  { %v1400_v24 = vpop.eup %1399 }
 0xedc   :  { %824 = vrot.lane.b32.xlu0 %v1400_v24, %s1473_s16 }
 0xedd   :  { %v1402_v6 = vpop.eup %1401 }
 0xede   :  { %v818_v26 = vadd.f32 1.0, %v1402_v6 }
 0xee0   :  { %1403 = vrcp.f32 %v818_v26 }
 0xeed   :  { %v1404_v9 = vpop.eup %1403 }
 0xeee   :  { %v822_v10 = vmul.f32 %v1404_v9, %v732_v13  ;;  %v1173_v13 = vld [vmem:[%s1763_s5] ss:$0 sm:$0xff] }
 0xf4e   :  { %v825_v27 = vpop.permute.xlu0 %824 }
 0xf4f   :  { %v827_v28 = vmul.f32 %v1404_v9, %v825_v27 }
 0xf51   :  { %829 = vrot.lane.b32.xlu1 %v827_v28, %s1474_s17 }
 0xfc3   :  { %v830_v29 = vpop.permute.xlu1 %829 }
 0xfc4   :  { %v832_v17 = vadd.f32 %v830_v29, %v822_v10 }
 0xfc6   :  { %1405 = vtanh.f32 %v832_v17 }
 0xfd3   :  { %v1406_v30 = vpop.eup %1405 }
 0xfd4   :  { %835 = vrot.lane.b32.xlu0 %v1406_v30, %s1473_s16 }
0x1046   :  { %v836_v31 = vpop.permute.xlu0 %835 }
0x1047   :  { %v838_v32 = vmul.f32 %v1404_v9, %v836_v31 }
0x1049   :  { %840 = vrot.lane.b32.xlu1 %v838_v32, %s1474_s17 }
0x10bb   :  { %v841_v33 = vpop.permute.xlu1 %840 }
0x10bc   :  { %1324 = vmatmul.mubr.msk.f32.vlgmr.msra.gmra.mxu0 %vm240_vm4, %v841_v33 }
0x10bd   :  { %1345 = vmatprep.mubr.msk.f32.mxu0 %vm1472_vm0, %v1471_v1  ;;  %1338 = vmatpush3.msra.mxu0 %v1042_v19 }
0x10be   :  { %1339 = vmatprep.subr.mxu0 %v1471_v1 }
0x10bf   :  { %1340 = vmatpush3.msra.mxu0 %v1041_v0 }
0x10c0   :  { %1341 = vmatprep.subr.mxu0 %v1471_v1 }
0x10c1   :  { %1342 = vmatpush3.msra.mxu0 %v1040_v2 }
0x10c2   :  { %1343 = vmatprep.subr.mxu0 %v1471_v1 }
0x10c3   :  { %1344 = vmatpush3.msra.mxu0 %v1039_v3 }
0x117c   :  { %v910_v35 = vpop.f32.mrf.mxu0 }
0x117d   :  { %v914_v36 = vadd.f32 %v910_v35, %v228_v34 }
0x117e   :  { %v1325_v37 = vpop.f32.mrf.mxu0 }
0x117f   :  { %1407 = vtanh.f32 %v914_v36  ;;  %v1170_v39 = vmul.f32 -1.442695, %v914_v36 }
0x1181   :  { %1409 = vpow2.f32 %v1170_v39 }
0x118c   :  { %v1408_v38 = vpop.eup %1407 }
0x118d   :  { %924 = vrot.lane.b32.xlu0 %v1408_v38, %s1473_s16 }
0x118e   :  { %v1410_v40 = vpop.eup %1409 }
0x118f   :  { %v918_v41 = vadd.f32 1.0, %v1410_v40 }
0x1191   :  { %1411 = vrcp.f32 %v918_v41 }
0x119e   :  { %v1412_v42 = vpop.eup %1411 }
0x119f   :  { %v922_v45 = vmul.f32 %v1412_v42, %v832_v17 }
0x11ff   :  { %v925_v43 = vpop.permute.xlu0 %924 }
0x1200   :  { %v927_v44 = vmul.f32 %v1412_v42, %v925_v43 }
0x1202   :  { %929 = vrot.lane.b32.xlu1 %v927_v44, %s1474_s17 }
0x1274   :  { %v930_v46 = vpop.permute.xlu1 %929 }
0x1275   :  { %v932_v21 = vadd.f32 %v930_v46, %v922_v45 }
0x1277   :  { %1413 = vtanh.f32 %v932_v21 }
0x1284   :  { %v1414_v47 = vpop.eup %1413 }
0x1285   :  { %935 = vrot.lane.b32.xlu0 %v1414_v47, %s1473_s16 }
0x12f7   :  { %v936_v48 = vpop.permute.xlu0 %935 }
0x12f8   :  { %v938_v49 = vmul.f32 %v1412_v42, %v936_v48 }
0x12fa   :  { %940 = vrot.lane.b32.xlu1 %v938_v49, %s1474_s17 }
0x136c   :  { %v941_v50 = vpop.permute.xlu1 %940 }
0x136d   :  { %1335 = vmatmul.mubr.msk.f32.vlgmr.msra.gmra.mxu1 %vm240_vm4, %v941_v50 }
0x142d   :  { %v1010_v52 = vpop.f32.mrf.mxu1 }
0x142e   :  { %v1014_v53 = vadd.f32 %v1010_v52, %v233_v51 }
0x142f   :  { %v1336_v54 = vpop.f32.mrf.mxu1 }
0x1430   :  { %1415 = vtanh.f32 %v1014_v53  ;;  %v1172_v56 = vmul.f32 -1.442695, %v1014_v53 }
0x1432   :  { %1417 = vpow2.f32 %v1172_v56 }
0x143d   :  { %v1416_v55 = vpop.eup %1415 }
0x143e   :  { %1024 = vrot.lane.b32.xlu0 %v1416_v55, %s1473_s16 }
0x143f   :  { %v1418_v57 = vpop.eup %1417 }
0x1440   :  { %v1018_v58 = vadd.f32 1.0, %v1418_v57 }
0x1442   :  { %1419 = vrcp.f32 %v1018_v58 }
0x144f   :  { %v1420_v59 = vpop.eup %1419 }
0x1450   :  { %v1022_v62 = vmul.f32 %v1420_v59, %v932_v21 }
0x14b0   :  { %v1025_v60 = vpop.permute.xlu0 %1024 }
0x14b1   :  { %v1027_v61 = vmul.f32 %v1420_v59, %v1025_v60 }
0x14b3   :  { %1029 = vrot.lane.b32.xlu1 %v1027_v61, %s1474_s17 }
0x1525   :  { %v1030_v63 = vpop.permute.xlu1 %1029 }
0x1526   :  { %v1032_v20 = vadd.f32 %v1030_v63, %v1022_v62 }
0x1528   :  { %1421 = vtanh.f32 %v1032_v20 }
0x1535   :  { %v1422_v5 = vpop.eup %1421 }
0x1536   :  { %1035 = vrot.lane.b32.xlu0 %v1422_v5, %s1473_s16 }
0x15a8   :  { %v1036_v7 = vpop.permute.xlu0 %1035 }
0x15a9   :  { %v1038_v8 = vmul.f32 %v1420_v59, %v1036_v7 }
0x15ab   :  { %1051 = vrot.lane.b32.xlu1 %v1038_v8, %s1474_s17 }
0x161d   :  { %v1052_v11 = vpop.permute.xlu1 %1051 }
0x161e   :  { %1346 = vmatmul.mubr.msk.f32.vlgmr.msra.gmra.mxu0 %vm240_vm4, %v1052_v11 }
0x16de   :  { %v1121_v14 = vpop.f32.mrf.mxu0 }
0x16df   :  { %v1122_v15 = vadd.f32 %v1173_v13, %v1121_v14 }
0x16e0   :  { %v1347_v1 = vpop.f32.mrf.mxu0 }
0x16e1   :  { %1125 = vst [vmem:[#allocation5] sm:$0xff] %v1122_v15 }
0x16e2   :  { %1454 = shalt.err (!%p1451_p9)
}
0x16e3   :  { %1135 = dma.vmem_to_hbm [thread:$0]  %s1133_s4, 128, %s1764_s6, [#allocation4]  }
0x16e4   :  { %1465 = dma.done.wait [#allocation4], 128  }
0x16e5   :  { %1466 = vsyncadd [#allocation4], 4294967168 }
0x16e6   :  { %1139 = vsyncpa [#allocation3], 1 }
0x16e7   :  { %1140 = vsyncpa [#allocation4], 1 }

</bundles_post_ra>
